<compile_context>
chip_gen: v7x
topology: tpu7x:2x2x1
jax: 0.10.0
libtpu: 0.0.40
codegen_flags: <defaults>
</compile_context>

<pallas_src>
import functools

import jax
import jax.numpy as jnp
from jax.experimental import pallas as pl
from jax.experimental.pallas import tpu as pltpu

_LANE = 128


def _round_up(n, m):
    return ((n + m - 1) // m) * m


def _cdiv(n, m):
    return (n + m - 1) // m


def _linear_bias_kernel(x_ref, w_ref, b_ref, o_ref, acc_ref):
    """Computes one (tm, tn) logits tile; grid axis 2 (innermost) is the K reduction."""

    @pl.when(pl.program_id(2) == 0)
    def _():
        acc_ref[...] = jnp.zeros_like(acc_ref)

    acc_ref[...] += jnp.dot(
        x_ref[...], w_ref[...], preferred_element_type=jnp.float32
    )

    @pl.when(pl.program_id(2) == pl.num_programs(2) - 1)
    def _():
        # Bias is added exactly once, outside the K reduction; output stays f32.
        o_ref[...] = (acc_ref[...] + b_ref[...]).astype(o_ref.dtype)


def prepare_linear_params(weight, bias, compute_dtype=jnp.bfloat16):
    """One-time parameter preprocessing — do NOT call per forward pass.

    weight: [out_dim, in_dim]   (PyTorch nn.Linear layout)
    bias:   [out_dim]

    Returns:
      w_t: [k_pad, n_pad]  weight transposed once, K (rows) and N (cols) both
           zero-padded to multiples of 128 so the kernel tiles are lane-dense
           and K always tiles cleanly.  Stored in `compute_dtype` (bf16 by
           default for HBM bandwidth + MXU rate).
      b2d: [1, n_pad]      f32 bias row (zero in the padded lanes).
    """
    out_dim, in_dim = weight.shape
    n_pad = _round_up(out_dim, _LANE)
    k_pad = _round_up(in_dim, _LANE)
    w_t = jnp.zeros((k_pad, n_pad), compute_dtype)
    w_t = w_t.at[:in_dim, :out_dim].set(weight.T.astype(compute_dtype))
    b2d = jnp.zeros((1, n_pad), jnp.float32)
    b2d = b2d.at[0, :out_dim].set(bias.astype(jnp.float32))
    return w_t, b2d


def _pick_tiles(B, k_pad, n_pad, sub_mult):
    """Static tile selection.  k_pad / n_pad are multiples of 128."""
    # N tile: biggest lane-dense tile up to 512 that divides n_pad.
    if n_pad <= 512:
        tn = n_pad
    else:
        tn = max(c for c in (512, 256, 128) if n_pad % c == 0)
    # K tile: biggest up to 1024 that divides k_pad (K is always 128-padded).
    if k_pad <= 1024:
        tk = k_pad
    else:
        tk = max(c for c in (1024, 512, 256, 128) if k_pad % c == 0)
    # M tile: cap 512; small batches use one sublane-aligned block (no M pad —
    # Pallas masks the ragged last block).
    tm = 512 if B >= 512 else _round_up(B, sub_mult)
    # v7x has 2 TensorCores: make sure the (M, N) parallel grid has >= 2 blocks
    # whenever the batch is big enough to split.  No-op cost on v5e/v6e (1 TC).
    if (_cdiv(B, tm) * (n_pad // tn)) == 1 and B > 2 * sub_mult:
        tm = _round_up(_cdiv(B, 2), sub_mult)
    return tm, tn, tk


@functools.partial(jax.jit, static_argnames=("out_dim", "force_pallas"))
def simple_classifier_forward(x, w_t, b2d, *, out_dim, force_pallas=False):
    """x: [B, in_dim]; w_t/b2d from prepare_linear_params. Returns [B, out_dim] f32."""
    B, in_dim = x.shape
    k_pad, n_pad = w_t.shape
    assert k_pad == _round_up(in_dim, _LANE), "params prepared for a different in_dim"
    assert n_pad >= out_dim

    cdtype = w_t.dtype
    sub_mult = 16 if cdtype == jnp.bfloat16 else 8

    # K zero-pad + compute-dtype cast (both fuse into a single XLA copy under jit).
    if k_pad != in_dim:
        x = jnp.pad(x, ((0, 0), (0, k_pad - in_dim)))
    x = x.astype(cdtype)

    # Tiny problems: pallas_call dispatch + per-step overhead dominates the
    # matmul, so let XLA fuse a plain dot instead.
    if not force_pallas and (B * k_pad * n_pad) < (1 << 22):
        out = jnp.dot(x, w_t, preferred_element_type=jnp.float32) + b2d
        return out[:, :out_dim]

    tm, tn, tk = _pick_tiles(B, k_pad, n_pad, sub_mult)
    grid = (_cdiv(B, tm), n_pad // tn, k_pad // tk)

    out = pl.pallas_call(
        _linear_bias_kernel,
        out_shape=jax.ShapeDtypeStruct((B, n_pad), jnp.float32),
        grid_spec=pltpu.PrefetchScalarGridSpec(
            num_scalar_prefetch=0,
            grid=grid,
            in_specs=[
                pl.BlockSpec((tm, tk), lambda i, j, k: (i, k)),   # x tile
                pl.BlockSpec((tk, tn), lambda i, j, k: (k, j)),   # w tile
                pl.BlockSpec((1, tn), lambda i, j, k: (0, j)),    # bias row
            ],
            out_specs=pl.BlockSpec((tm, tn), lambda i, j, k: (i, j)),
            scratch_shapes=[pltpu.VMEM((tm, tn), jnp.float32)],
        ),
        compiler_params=pltpu.CompilerParams(
            dimension_semantics=("parallel", "parallel", "arbitrary")
        ),
    )(x, w_t, b2d)

    # Only the lane padding is sliced off; M is already exact (no M padding).
    return out[:, :out_dim]


if __name__ == "__main__":
    # Shapes consistent with SimpleClassifier(in_dim, hid_dim, out_dim, dropout);
    # hid_dim / dropout only feed the unused `self.main` branch.  Small shapes
    # chosen to exercise K zero-padding (160 -> 256), lane padding (10 -> 128)
    # and the multi-block parallel M grid.
    batch, in_dim, hid_dim, out_dim = 64, 160, 64, 10

    key = jax.random.PRNGKey(0)
    kx, kw, kb = jax.random.split(key, 3)

    x = jax.random.normal(kx, (batch, in_dim), dtype=jnp.float32)
    # Deterministic init mimicking nn.Linear's uniform(-1/sqrt(in_dim), 1/sqrt(in_dim))
    bound = 1.0 / (in_dim ** 0.5)
    weight = jax.random.uniform(
        kw, (out_dim, in_dim), minval=-bound, maxval=bound, dtype=jnp.float32
    )
    bias = jax.random.uniform(
        kb, (out_dim,), minval=-bound, maxval=bound, dtype=jnp.float32
    )

    # TODO(synk): weight-normed `self.main` MLP (Linear+ReLU+Dropout+Linear) is
    # constructed by __init__ but never used in forward(); not implemented.

    # One-time parameter prep (transpose + K/N zero-pad, bf16 operands by default).
    w_t, b2d = prepare_linear_params(weight, bias)

    # force_pallas=True so the demo exercises the Pallas kernel even though the
    # problem is below the tiny-problem XLA-fallback threshold.
    logits = simple_classifier_forward(x, w_t, b2d, out_dim=out_dim, force_pallas=True)
    jax.block_until_ready(logits)

    # Reference check in plain JAX (f32).  bf16 matmul inputs + f32 accumulation
    # -> tolerance relaxed accordingly.
    ref = x @ weight.T + bias
    assert logits.shape == (batch, out_dim)
    assert jnp.allclose(logits, ref, atol=2e-2, rtol=2e-2), float(
        jnp.max(jnp.abs(logits - ref))
    )

    print("KERNEL_OK")
</pallas_src>

<mosaic_0001>
module attributes {stable_mosaic.version = 11 : i64} {
  func.func @_linear_bias_kernel(%arg0: i32, %arg1: i32, %arg2: i32, %arg3: memref<32x256xbf16, #tpu.memory_space<vmem>>, %arg4: memref<256x128xbf16, #tpu.memory_space<vmem>>, %arg5: memref<1x128xf32, #tpu.memory_space<vmem>>, %arg6: memref<32x128xf32, #tpu.memory_space<vmem>>, %arg7: memref<32x128xf32, #tpu.memory_space<vmem>>) attributes {dimension_semantics = [#tpu.dimension_semantics<parallel>, #tpu.dimension_semantics<parallel>, #tpu.dimension_semantics<arbitrary>], iteration_bounds = array<i64: 2, 1, 1>, scalar_prefetch = 0 : i64, scratch_operands = 1 : i64, tpu.core_type = #tpu.core_type<tc>, window_params = [{transform_indices = @transform_0, window_bounds = array<i64: 32, 256>}, {transform_indices = @transform_1, window_bounds = array<i64: 256, 128>}, {transform_indices = @transform_2, window_bounds = array<i64: 1, 128>}, {transform_indices = @transform_3, window_bounds = array<i64: 32, 128>}]} {
    %c0_i32 = arith.constant 0 : i32
    %0 = arith.cmpi eq, %arg2, %c0_i32 : i32
    %1 = arith.extui %0 : i1 to i32
    %c0_i32_0 = arith.constant 0 : i32
    %2 = arith.cmpi ne, %1, %c0_i32_0 : i32
    scf.if %2 {
      %cst_10 = arith.constant 0.000000e+00 : f32
      %12 = vector.broadcast %cst_10 : f32 to vector<32x128xf32>
      %c0_11 = arith.constant 0 : index
      %c0_12 = arith.constant 0 : index
      %13 = vector.load %arg7[%c0_11, %c0_12] : memref<32x128xf32, #tpu.memory_space<vmem>>, vector<32x128xf32>
      tpu.vector_store %arg7[%c0_11, %c0_12], %12 {strides = array<i32>} : memref<32x128xf32, #tpu.memory_space<vmem>>, vector<32x128xf32>,
    } else {
    }
    %c0 = arith.constant 0 : index
    %c0_1 = arith.constant 0 : index
    %3 = vector.load %arg7[%c0, %c0_1] : memref<32x128xf32, #tpu.memory_space<vmem>>, vector<32x128xf32>
    %c0_2 = arith.constant 0 : index
    %c0_3 = arith.constant 0 : index
    %4 = vector.load %arg3[%c0_2, %c0_3] : memref<32x256xbf16, #tpu.memory_space<vmem>>, vector<32x256xbf16>
    %c0_4 = arith.constant 0 : index
    %c0_5 = arith.constant 0 : index
    %5 = vector.load %arg4[%c0_4, %c0_5] : memref<256x128xbf16, #tpu.memory_space<vmem>>, vector<256x128xbf16>
    %cst = arith.constant dense<0.000000e+00> : vector<32x128xf32>
    %6 = tpu.matmul %4, %5, %cst {dimension_numbers = #tpu.dot_dimension_numbers<[1], [0], [0], [1], [0, 0, 1, 1], [], []>} : vector<32x256xbf16>, vector<256x128xbf16>, vector<32x128xf32> -> vector<32x128xf32>
    %7 = arith.addf %3, %6 : vector<32x128xf32>
    %c0_6 = arith.constant 0 : index
    %c0_7 = arith.constant 0 : index
    %8 = vector.load %arg7[%c0_6, %c0_7] : memref<32x128xf32, #tpu.memory_space<vmem>>, vector<32x128xf32>
    tpu.vector_store %arg7[%c0_6, %c0_7], %7 {strides = array<i32>} : memref<32x128xf32, #tpu.memory_space<vmem>>, vector<32x128xf32>,
    %c0_i32_8 = arith.constant 0 : i32
    %9 = arith.cmpi eq, %arg2, %c0_i32_8 : i32
    %10 = arith.extui %9 : i1 to i32
    %c0_i32_9 = arith.constant 0 : i32
    %11 = arith.cmpi ne, %10, %c0_i32_9 : i32
    scf.if %11 {
      %c0_10 = arith.constant 0 : index
      %c0_11 = arith.constant 0 : index
      %12 = vector.load %arg7[%c0_10, %c0_11] : memref<32x128xf32, #tpu.memory_space<vmem>>, vector<32x128xf32>
      %c0_12 = arith.constant 0 : index
      %c0_13 = arith.constant 0 : index
      %13 = vector.load %arg5[%c0_12, %c0_13] : memref<1x128xf32, #tpu.memory_space<vmem>>, vector<1x128xf32>
      %14 = vector.broadcast %13 : vector<1x128xf32> to vector<32x128xf32>
      %15 = arith.addf %12, %14 : vector<32x128xf32>
      %c0_14 = arith.constant 0 : index
      %c0_15 = arith.constant 0 : index
      %16 = vector.load %arg6[%c0_14, %c0_15] : memref<32x128xf32, #tpu.memory_space<vmem>>, vector<32x128xf32>
      tpu.vector_store %arg6[%c0_14, %c0_15], %15 {strides = array<i32>} : memref<32x128xf32, #tpu.memory_space<vmem>>, vector<32x128xf32>,
    } else {
    }
    return
  }
  func.func @transform_0(%arg0: i32, %arg1: i32, %arg2: i32) -> (i32, i32) {
    %c0_i32 = arith.constant 0 : i32
    return %arg0, %arg2 : i32, i32
  }
  func.func @transform_1(%arg0: i32, %arg1: i32, %arg2: i32) -> (i32, i32) {
    %c0_i32 = arith.constant 0 : i32
    return %arg2, %arg1 : i32, i32
  }
  func.func @transform_2(%arg0: i32, %arg1: i32, %arg2: i32) -> (i32, i32) {
    %c0_i32 = arith.constant 0 : i32
    %c0_i32_0 = arith.constant 0 : i32
    return %c0_i32, %arg1 : i32, i32
  }
  func.func @transform_3(%arg0: i32, %arg1: i32, %arg2: i32) -> (i32, i32) {
    %c0_i32 = arith.constant 0 : i32
    return %arg0, %arg1 : i32, i32
  }
}

</mosaic_0001>

<bundles_post_ra>
// kernel: simple_classifier_forward.1
= control target key start
LH: loop header
LB: loop body
LE: loop exit
PB: predicated region body
PF: predicated region fallthrough
CT: control target
= control target key end

     0   :  { %s795_s12 = smov 0   ;;  %s797_s13 = smov 0   ;;  %s886_s0 = inlined_call_operand.vmem [shape: bf16[64,256], index: 0, kind: input, shape index: {}]   ;;  %s887_s1 = inlined_call_operand.vmem [shape: bf16[256,128], index: 1, kind: input, shape index: {}]   ;;  %s888_s2 = inlined_call_operand.vmem [shape: f32[1,128], index: 2, kind: input, shape index: {}]   ;;  %s889_s3 = inlined_call_operand.vmem [shape: f32[64,128], index: 3, kind: output, shape index: {}]  }
   0x1   :  { %s799_s14 = smov 0  }
   0x2 LB: > { %s32_s15 = sadd.s32 1, %s769_s13  ;;  %p631_p0 = scmp.ge.s32.totalorder %s773_s14, 1  ;;  %s773_s14 = sphi %s799_s14, %s13_s14   ;;  %s769_s13 = sphi %s797_s13, %s891_s13   ;;  %s765_s12 = sphi %s795_s12, %s890_s12  }
   0x3   : > { %p34_p1 = scmp.ge.s32.totalorder %s32_s15, 2  ;;  %p191_p2 = scmp.lt.s32.totalorder %s773_s14, 3 }
   0x5   : > { %s893_s15 = smov (%p34_p1, %s32_s15), 0  ;;  %p192_p3 = pnand %p631_p0, %p191_p2 }
   0x6   : > { %v729_v0 = vld [vmem:[%s887_s1 + $0x40] sm:$0xff] (!%p192_p3)   ;;  %s632_s18 = sshll.u32 (!%p192_p3), %s765_s12, 2  ;;  %v731_v2 = vld [vmem:[%s887_s1 + $0x48] sm:$0xff] (!%p192_p3)   ;;  %v733_v4 = vld [vmem:[%s887_s1 + $0x50] sm:$0xff] (!%p192_p3)  }
   0x7   : > { %195 = sbr.rel (%p192_p3) target bundleno = 259 (0x103), region = 32  ;;  %v730_v1 = vld [vmem:[%s887_s1] sm:$0xff] (!%p192_p3)   ;;  %661 = vmatprep.subr.bf16.mxu0 (!%p192_p3), %v729_v0  ;;  %689 = vmatprep.subr.bf16.mxu1 (!%p192_p3), %v729_v0  ;;  %v732_v3 = vld [vmem:[%s887_s1 + $0x8] sm:$0xff] (!%p192_p3)   ;;  %p236_p4 = scmp.lt.s32.totalorder (!%p192_p3), %s632_s18, 7  ;;  %v734_v5 = vld [vmem:[%s887_s1 + $0x10] sm:$0xff] (!%p192_p3)  }
   0x8   : > { %662 = vmatpush3.bf16.msra.mxu0 (!%p192_p3), %v730_v1  ;;  %697 = vmatpush3.bf16.msra.mxu1 (!%p192_p3), %v730_v1  ;;  %v735_v6 = vld [vmem:[%s887_s1 + $0x58] sm:$0xff] (!%p192_p3)   ;;  %v737_v8 = vld [vmem:[%s887_s1 + $0x60] sm:$0xff] (!%p192_p3)   ;;  %v739_v10 = vld [vmem:[%s887_s1 + $0x68] sm:$0xff] (!%p192_p3)  }
   0x9   : > { %663 = vmatprep.subr.bf16.mxu0 (!%p192_p3), %v731_v2  ;;  %690 = vmatprep.subr.bf16.mxu1 (!%p192_p3), %v731_v2  ;;  %v736_v7 = vld [vmem:[%s887_s1 + $0x18] sm:$0xff] (!%p192_p3)   ;;  %v738_v9 = vld [vmem:[%s887_s1 + $0x20] sm:$0xff] (!%p192_p3)   ;;  %v740_v13 = vld [vmem:[%s887_s1 + $0x28] sm:$0xff] (!%p192_p3)  }
   0xa   : > { %v741_v14 = vld [vmem:[%s887_s1 + $0x70] sm:$0xff] (!%p192_p3)   ;;  %v743_v16 = vld [vmem:[%s887_s1 + $0x78] sm:$0xff] (!%p192_p3)   ;;  %v657_v23 = vld [vmem:[%s888_s2] ss:$0 sm:$0xff] (!%p192_p3) }
   0xb   : > { %v742_v15 = vld [vmem:[%s887_s1 + $0x30] sm:$0xff] (!%p192_p3)   ;;  %v744_v17 = vld [vmem:[%s887_s1 + $0x38] sm:$0xff] (!%p192_p3)  }
   0xc   : > { %664 = vmatpush3.bf16.msra.mxu0 (!%p192_p3), %v732_v3  ;;  %698 = vmatpush3.bf16.msra.mxu1 (!%p192_p3), %v732_v3 }
   0xd   : > { %665 = vmatprep.subr.bf16.mxu0 (!%p192_p3), %v733_v4  ;;  %691 = vmatprep.subr.bf16.mxu1 (!%p192_p3), %v733_v4 }
   0xe   : > { %s895_s18 = smov (!%p236_p4, %s632_s18), 7 }
   0xf   : > { %s660_s6 = sshll.u32 %s895_s18, 3 }
  0x10   : > { %666 = vmatpush3.bf16.msra.mxu0 %v734_v5  ;;  %699 = vmatpush3.bf16.msra.mxu1 %v734_v5  ;;  %s243_s11 = scalar_lea.vmem %s886_s0, %s660_s6  ;;  %s265_s8 = scalar_lea.vmem %s889_s3, %s660_s6 }
  0x11   : > { %667 = vmatprep.subr.bf16.mxu0 %v735_v6  ;;  %692 = vmatprep.subr.bf16.mxu1 %v735_v6  ;;  %v747_v11 = vld [vmem:[%s243_s11 + $0x4] ss:$8 sps:$4 sm:$0xff]   ;;  %v750_v12 = vld [vmem:[%s243_s11 + $0x14] ss:$8 sps:$4 sm:$0xff]   ;;  %v745_v18 = vld [vmem:[%s243_s11] ss:$8 sps:$4 sm:$0xff]  }
  0x12   : > { %464 = vmatprep.mubr.bf16.mxu0 %v747_v11  ;;  %472 = vmatprep.mubr.bf16.mxu1 %v750_v12  ;;  %v748_v19 = vld [vmem:[%s243_s11 + $0x10] ss:$8 sps:$4 sm:$0xff]  }
  0x14   : > { %668 = vmatpush3.bf16.msra.mxu0 %v736_v7  ;;  %700 = vmatpush3.bf16.msra.mxu1 %v736_v7 }
  0x15   : > { %669 = vmatprep.subr.bf16.mxu0 %v737_v8  ;;  %693 = vmatprep.subr.bf16.mxu1 %v737_v8 }
  0x18   : > { %670 = vmatpush3.bf16.msra.mxu0 %v738_v9  ;;  %701 = vmatpush3.bf16.msra.mxu1 %v738_v9 }
  0x19   : > { %671 = vmatprep.subr.bf16.mxu0 %v739_v10  ;;  %694 = vmatprep.subr.bf16.mxu1 %v739_v10 }
  0x1c   : > { %672 = vmatpush3.bf16.msra.mxu0 %v740_v13  ;;  %702 = vmatpush3.bf16.msra.mxu1 %v740_v13 }
  0x1d   : > { %673 = vmatprep.subr.bf16.mxu0 %v741_v14  ;;  %695 = vmatprep.subr.bf16.mxu1 %v741_v14 }
  0x20   : > { %674 = vmatpush3.bf16.msra.mxu0 %v742_v15  ;;  %703 = vmatpush3.bf16.msra.mxu1 %v742_v15 }
  0x21   : > { %675 = vmatprep.subr.bf16.mxu0 %v743_v16  ;;  %696 = vmatprep.subr.bf16.mxu1 %v743_v16 }
  0x24   : > { %676 = vmatpush3.bf16.msra.mxu0 %v744_v17  ;;  %704 = vmatpush3.bf16.msra.mxu1 %v744_v17 }
  0x27   : > { %465 = vmatmul.mubr.bf16.vlgmr.msra.gmra.mrb[0].mxu0 %v745_v18  ;;  %473 = vmatmul.mubr.bf16.vlgmr.msra.gmra.mrb[0].mxu1 %v748_v19 }
  0xfa   : > { %v677_v20 = vpop.f32.mrb[0].mxu0  ;;  %v683_v21 = vpop.f32.mrb[0].mxu1 }
  0xfb   : > { %v678_v22 = vpop.f32.mrb[1].mxu0  ;;  %v684_v24 = vpop.f32.mrb[1].mxu1 }
  0xfc   : > { %v679_v25 = vadd.f32 %v678_v22, %v677_v20  ;;  %v685_v26 = vadd.f32 %v684_v24, %v683_v21  ;;  %v680_v27 = vpop.f32.mrb[2].mxu0  ;;  %v686_v28 = vpop.f32.mrb[2].mxu1 }
  0xfd   : > { %v681_v29 = vpop.f32.mrb[3].mxu0  ;;  %v687_v30 = vpop.f32.mrb[3].mxu1 }
  0xfe   : > { %v503_v31 = vadd.f32 %v679_v25, %v657_v23  ;;  %v682_v32 = vadd.f32 %v681_v29, %v680_v27  ;;  %v688_v33 = vadd.f32 %v687_v30, %v686_v28  ;;  %v505_v35 = vadd.f32 %v685_v26, %v657_v23 }
 0x100   : > { %507 = vst [vmem:[%s265_s8] sm:$0xff] %v503_v31  ;;  %v504_v34 = vadd.f32 %v682_v32, %v657_v23  ;;  %v506_v36 = vadd.f32 %v688_v33, %v657_v23  ;;  %509 = vst [vmem:[%s265_s8 + $0x10] sm:$0xff] %v505_v35 }
 0x102   : > { %508 = vst [vmem:[%s265_s8 + $0x8] sm:$0xff] %v504_v34  ;;  %510 = vst [vmem:[%s265_s8 + $0x18] sm:$0xff] %v506_v36 }
 0x103 PF: > { %s13_s14 = sadd.s32 1, %s773_s14   ;;  %s890_s12 = smov %s769_s13 }
 0x104   : > { %p10_p5 = scmp.ge.s32.totalorder %s13_s14, 4   ;;  %s891_s13 = smov %s893_s15 }
 0x106   :  { %12 = sbr.rel (!%p10_p5) target bundleno = 2 (0x2), region = 76 }

</bundles_post_ra>
